<compile_context>
chip_gen: v7x
topology: tpu7x:2x2x1
jax: 0.10.0
libtpu: 0.0.40
codegen_flags: <defaults>
</compile_context>

<pallas_src>
import jax
import jax.numpy as jnp
from jax.experimental import pallas as pl
from jax.experimental.pallas import tpu as pltpu


def _pool_rows_kernel(x_ref, max_ref, avg_ref):
    # x_ref:   (TILE_ROWS, H*W) in VMEM
    # max_ref: (TILE_ROWS, 1)   adaptive max pool result for these rows
    # avg_ref: (TILE_ROWS, 1)   adaptive avg pool result for these rows
    x = x_ref[...]
    hw = x.shape[-1]
    mx = jnp.max(x, axis=-1, keepdims=True)                       # native dtype
    sm = jnp.sum(x, axis=-1, keepdims=True, dtype=jnp.float32)    # f32 accumulate
    max_ref[...] = mx.astype(max_ref.dtype)
    avg_ref[...] = (sm * (1.0 / hw)).astype(avg_ref.dtype)


def _choose_tile_rows(num_rows, hw, itemsize, target_bytes=2 * 1024 * 1024):
    # Aim for ~2 MiB per input block (double-buffered -> ~4 MiB VMEM), rows a
    # multiple of 8.  Falling back to the full row extent is always legal.
    lanes = max(hw, 128)  # account for lane padding of narrow spatial dims
    rows = max(8, target_bytes // (lanes * itemsize))
    rows = max(8, (int(rows) // 8) * 8)
    if rows >= num_rows:
        return num_rows
    return rows


def adaptive_concat_pool2d(x, tile_rows=None):
    """x: (N, C, H, W) -> (N, 2*C, 1, 1), concat([maxpool, avgpool], channel)."""
    N, C, H, W = x.shape
    R = N * C
    HW = H * W
    itemsize = jnp.dtype(x.dtype).itemsize

    x2 = x.reshape(R, HW)

    if tile_rows is None:
        tile_rows = _choose_tile_rows(R, HW, itemsize)
    else:
        tile_rows = min(tile_rows, R)
        if tile_rows < R:
            tile_rows = max(8, (tile_rows // 8) * 8)

    grid = (pl.cdiv(R, tile_rows),)

    cost = pl.CostEstimate(
        flops=2 * R * HW,            # one compare + one add per element
        transcendentals=0,
        bytes_accessed=R * HW * itemsize + 2 * R * itemsize,
    )

    mx, av = pl.pallas_call(
        _pool_rows_kernel,
        out_shape=(
            jax.ShapeDtypeStruct((R, 1), x.dtype),
            jax.ShapeDtypeStruct((R, 1), x.dtype),
        ),
        grid=grid,
        in_specs=[pl.BlockSpec((tile_rows, HW), lambda i: (i, 0))],
        out_specs=(
            pl.BlockSpec((tile_rows, 1), lambda i: (i, 0)),
            pl.BlockSpec((tile_rows, 1), lambda i: (i, 0)),
        ),
        compiler_params=pltpu.CompilerParams(
            dimension_semantics=("parallel",),
        ),
        cost_estimate=cost,
    )(x2)

    mx = mx.reshape(N, C, 1, 1)
    av = av.reshape(N, C, 1, 1)
    return jnp.concatenate([mx, av], axis=1)


if __name__ == "__main__":
    key = jax.random.PRNGKey(0)
    N, C, H, W = 2, 4, 16, 16
    x = jax.random.normal(key, (N, C, H, W), dtype=jnp.float32)

    y = adaptive_concat_pool2d(x)
    y = jax.block_until_ready(y)

    # Reference check against plain JAX (same semantics as the PyTorch module).
    ref_max = jnp.max(x, axis=(2, 3), keepdims=True)
    ref_avg = jnp.mean(x, axis=(2, 3), keepdims=True)
    ref = jnp.concatenate([ref_max, ref_avg], axis=1)

    assert y.shape == (N, 2 * C, 1, 1), y.shape
    assert jnp.allclose(y, ref, atol=1e-5, rtol=1e-5)

    print("KERNEL_OK")
</pallas_src>

<mosaic_0001>
module attributes {stable_mosaic.version = 11 : i64} {
  func.func @_pool_rows_kernel(%arg0: i32, %arg1: memref<8x256xf32, #tpu.memory_space<vmem>>, %arg2: memref<8x1xf32, #tpu.memory_space<vmem>>, %arg3: memref<8x1xf32, #tpu.memory_space<vmem>>) attributes {dimension_semantics = [#tpu.dimension_semantics<parallel>], iteration_bounds = array<i64: 1>, scalar_prefetch = 0 : i64, scratch_operands = 0 : i64, tpu.core_type = #tpu.core_type<tc>, window_params = [{transform_indices = @transform_0, window_bounds = array<i64: 8, 256>}, {transform_indices = @transform_1, window_bounds = array<i64: 8, 1>}, {transform_indices = @transform_2, window_bounds = array<i64: 8, 1>}]} {
    %c0 = arith.constant 0 : index
    %c0_0 = arith.constant 0 : index
    %0 = vector.load %arg1[%c0, %c0_0] : memref<8x256xf32, #tpu.memory_space<vmem>>, vector<8x256xf32>
    %cst = arith.constant dense<0xFF800000> : vector<8xf32>
    %1 = vector.multi_reduction <maximumf>, %0, %cst [1] : vector<8x256xf32> to vector<8xf32>
    %2 = vector.shape_cast %1 : vector<8xf32> to vector<8x1xf32>
    %cst_1 = arith.constant dense<0.000000e+00> : vector<8xf32>
    %3 = vector.multi_reduction <add>, %0, %cst_1 [1] : vector<8x256xf32> to vector<8xf32>
    %4 = vector.shape_cast %3 : vector<8xf32> to vector<8x1xf32>
    %c0_2 = arith.constant 0 : index
    %c0_3 = arith.constant 0 : index
    %5 = vector.load %arg2[%c0_2, %c0_3] : memref<8x1xf32, #tpu.memory_space<vmem>>, vector<8x1xf32>
    tpu.vector_store %arg2[%c0_2, %c0_3], %2 {strides = array<i32>} : memref<8x1xf32, #tpu.memory_space<vmem>>, vector<8x1xf32>,
    %cst_4 = arith.constant 3.906250e-03 : f32
    %6 = vector.broadcast %cst_4 : f32 to vector<8x1xf32>
    %7 = arith.mulf %4, %6 : vector<8x1xf32>
    %c0_5 = arith.constant 0 : index
    %c0_6 = arith.constant 0 : index
    %8 = vector.load %arg3[%c0_5, %c0_6] : memref<8x1xf32, #tpu.memory_space<vmem>>, vector<8x1xf32>
    tpu.vector_store %arg3[%c0_5, %c0_6], %7 {strides = array<i32>} : memref<8x1xf32, #tpu.memory_space<vmem>>, vector<8x1xf32>,
    return
  }
  func.func @transform_0(%arg0: i32) -> (i32, i32) {
    %c0_i32 = arith.constant 0 : i32
    %c0_i32_0 = arith.constant 0 : i32
    return %arg0, %c0_i32 : i32, i32
  }
  func.func @transform_1(%arg0: i32) -> (i32, i32) {
    %c0_i32 = arith.constant 0 : i32
    %c0_i32_0 = arith.constant 0 : i32
    return %arg0, %c0_i32 : i32, i32
  }
  func.func @transform_2(%arg0: i32) -> (i32, i32) {
    %c0_i32 = arith.constant 0 : i32
    %c0_i32_0 = arith.constant 0 : i32
    return %arg0, %c0_i32 : i32, i32
  }
}

</mosaic_0001>

<bundles_post_ra>
// kernel: tpu_custom_call.1
= control target key start
LH: loop header
LB: loop body
LE: loop exit
PB: predicated region body
PF: predicated region fallthrough
CT: control target
= control target key end

     0   :  { %8 = vsyncpa [#allocation3], 0  ;;  %s68_s9 = smov [#allocation2]   ;;  %s102_s0 = inlined_call_operand.hbm [shape: f32[8,256], index: 0, kind: input, shape index: {}]   ;;  %s103_s1 = inlined_call_operand.vmem [shape: f32[8,1], index: 1, kind: output, shape index: {0}]   ;;  %s104_s2 = inlined_call_operand.vmem [shape: f32[8,1], index: 2, kind: output, shape index: {1}]  }
   0x1   :  { %s15_s10 = sshll.u32 %s68_s9, 4  ;;  %s44_s13 = scalar_lea.hbm %s102_s0, 256  ;;  %s16_s10 = int_to_ptr.vmem [resolvable:$true] %s15_s10 }
   0x2   :  { %p45_p0 = scmp.ne.s32.totalorder %s102_s0, %s44_s13  ;;  %p48_p1 = scmp.lt.u32.totalorder %s44_s13, %s102_s0 }
   0x4   :  { %p50_p2 = pnand %p48_p1, %p45_p0 }
   0x6   :  { %53 = shalt.err (!%p50_p2)
}
   0x7   :  { %s54_s18 = scalar_lea.vmem %s16_s10, 256  ;;  %p59_p4 = scmp.lt.s32.totalorder %s16_s10, %s16_s10 }
   0x8   :  { %p55_p3 = scmp.ne.s32.totalorder %s16_s10, %s54_s18  ;;  %p60_p5 = scmp.lt.s32.totalorder %s54_s18, %s54_s18 }
   0xa   :  { %p61_p6 = por %p60_p5, %p59_p4 }
   0xc   :  { %p62_p7 = pnand %p61_p6, %p55_p3 }
   0xe   :  { %65 = shalt.err (!%p62_p7)
}
   0xf   :  { %18 = dma.hbm_to_vmem [thread:$0]  %s102_s0, 256, %s16_s10, [#allocation3]  }
  0x10   :  { %66 = dma.done.wait [#allocation3], 256  }
  0x11   :  { %67 = vsyncadd [#allocation3], 4294967040  ;;  %v22_v0 = vld [vmem:[#allocation2] sm:$0xff]  ;;  %v23_v1 = vld [vmem:[#allocation2 + $0x8] sm:$0xff]  ;;  %vm30_vm0 = vcmask 7168  }
  0x12   :  { %v27_v2 = vadd.f32 %v23_v1, %v22_v0  ;;  %v24_v3 = vmax.f32 %v22_v0, %v23_v1 }
  0x14   :  { %28 = vadd.xlane.f32.xlu0 %v27_v2 }
  0x18   :  { %25 = vmax.xlane.f32.xlu0 %v24_v3 }
  0xa1   :  { %v29_v4 = vpop.xlane.xlu0 %28 }
  0xa2   :  { %v32_v5 = vmul.f32 0.00390625, %v29_v4 }
  0xa4   :  { %33 = vst.msk [vmem:[%s104_s2] sm:$0xff] %vm30_vm0, %v32_v5 }
  0xa5   :  { %v26_v6 = vpop.xlane.xlu0 %25 }
  0xa6   :  { %31 = vst.msk [vmem:[%s103_s1] sm:$0xff] %vm30_vm0, %v26_v6 }
  0xa7   :  { %42 = vsyncpa [#allocation3], 1 }

</bundles_post_ra>
